<compile_context>
chip_gen: v7x
topology: tpu7x:2x2x1
jax: 0.10.0
libtpu: 0.0.40
codegen_flags: <defaults>
</compile_context>

<pallas_src>
import functools

import jax
import jax.numpy as jnp
from jax.experimental import pallas as pl
from jax.experimental.pallas import tpu as pltpu

NUM_POINTS = 64
BOTTLENECK = 32
BATCH = 8
BN_EPS = 1e-5


# --------------------------------------------------------------------------
# Kernels
# --------------------------------------------------------------------------
def _mlp_bn_kernel(x_ref, w1_ref, w2_ref, w3_ref, bnp_ref, h_ref, *, d2, d3):
    """fc1/bn1/relu -> fc2/bn2/relu -> fc3/bn3/relu on the full batch block."""

    def linear(h, w_ref):
        # bf16 x bf16 -> f32 MXU path; accumulation and BN math stay f32.
        return jnp.dot(h.astype(jnp.bfloat16), w_ref[...],
                       preferred_element_type=jnp.float32)

    def bn_relu(h, gamma, beta):
        # Folded training-mode BatchNorm1d (biased variance over the batch).
        mean = jnp.mean(h, axis=0, keepdims=True)
        var = jnp.maximum(jnp.mean(h * h, axis=0, keepdims=True) - mean * mean, 0.0)
        scale = gamma * jax.lax.rsqrt(var + BN_EPS)
        shift = beta - mean * scale
        return jnp.maximum(h * scale + shift, 0.0)

    x = x_ref[...].astype(jnp.float32)
    # Packed BN affine params: rows [g1, be1, g2, be2, g3, be3], padded to d1.
    h = bn_relu(linear(x, w1_ref), bnp_ref[0:1, :], bnp_ref[1:2, :])
    h = bn_relu(linear(h, w2_ref), bnp_ref[2:3, :d2], bnp_ref[3:4, :d2])
    h = bn_relu(linear(h, w3_ref), bnp_ref[4:5, :d3], bnp_ref[5:6, :d3])
    h_ref[...] = h


def _fc4_tanh_kernel(h_ref, w4_ref, b4_ref, out_ref):
    """fc4 + tanh on a (batch tile, lane-dense output-column tile)."""
    acc = jnp.dot(h_ref[...].astype(jnp.bfloat16), w4_ref[...],
                  preferred_element_type=jnp.float32)
    acc = acc + b4_ref[...]
    # TODO(synk): a bf16 tanh would halve EUP cost on v6e/v7x; kept f32 to
    # match the PyTorch f32 forward numerics.
    out_ref[...] = jnp.tanh(acc).astype(out_ref.dtype)


# --------------------------------------------------------------------------
# Wrapper
# --------------------------------------------------------------------------
def _pick_col_tile(n_out, cap=2048):
    """Largest multiple of 128 that divides n_out and is <= cap."""
    best = None
    t = 128
    while t <= min(cap, n_out):
        if n_out % t == 0:
            best = t
        t += 128
    return best if best is not None else n_out


def point_decoder_normal(x, prep, num_points=NUM_POINTS):
    """x: (B, bottleneck) f32, prep: output of prepare_params -> (B, N, 6)."""
    w1b, w2b, w3b = prep["w1b"], prep["w2b"], prep["w3b"]
    bn_packed, w4b, b4p = prep["bn_packed"], prep["w4b"], prep["b4p"]
    B, d0 = x.shape
    d1, d2, d3 = w1b.shape[1], w2b.shape[1], w3b.shape[1]
    n_out = w4b.shape[1]
    assert n_out == num_points * 6

    # ---- Stage 1: fc1..fc3 + BN + relu (full batch => exact BN stats). ----
    mlp_cost = pl.CostEstimate(
        flops=2 * B * (d0 * d1 + d1 * d2 + d2 * d3),
        transcendentals=d1 + d2 + d3,
        bytes_accessed=(x.size * 4 + (w1b.size + w2b.size + w3b.size) * 2
                        + bn_packed.size * 4 + B * d3 * 4),
    )
    h3 = pl.pallas_call(
        functools.partial(_mlp_bn_kernel, d2=d2, d3=d3),
        out_shape=jax.ShapeDtypeStruct((B, d3), jnp.float32),
        grid_spec=pl.GridSpec(
            grid=(1,),
            in_specs=[
                pl.BlockSpec((B, d0), lambda i: (0, 0)),
                pl.BlockSpec((d0, d1), lambda i: (0, 0)),
                pl.BlockSpec((d1, d2), lambda i: (0, 0)),
                pl.BlockSpec((d2, d3), lambda i: (0, 0)),
                pl.BlockSpec(bn_packed.shape, lambda i: (0, 0)),
            ],
            out_specs=pl.BlockSpec((B, d3), lambda i: (0, 0)),
        ),
        compiler_params=pltpu.CompilerParams(
            dimension_semantics=("arbitrary",),
            vmem_limit_bytes=32 * 1024 * 1024),
        cost_estimate=mlp_cost,
    )(x, w1b, w2b, w3b, bn_packed)

    # ---- Stage 2: fc4 + tanh, lane-dense tiles, pipelined parallel grid. ----
    tn = _pick_col_tile(n_out)                       # 2048 at real sizes
    tb = 256 if (B > 256 and B % 256 == 0) else B    # VMEM-friendly batch tile
    gn, gb = n_out // tn, B // tb

    fc4_cost = pl.CostEstimate(
        flops=2 * B * d3 * n_out,
        transcendentals=B * n_out,
        bytes_accessed=B * d3 * 4 + w4b.size * 2 + b4p.size * 4 + B * n_out * 4,
    )
    out_flat = pl.pallas_call(
        _fc4_tanh_kernel,
        out_shape=jax.ShapeDtypeStruct((B, n_out), jnp.float32),
        grid_spec=pl.GridSpec(
            # Columns outer, batch inner: each w4/b4 column tile is streamed
            # from HBM exactly once; the small h tile is re-fetched instead.
            grid=(gn, gb),
            in_specs=[
                pl.BlockSpec((tb, d3), lambda j, i: (i, 0)),
                pl.BlockSpec((d3, tn), lambda j, i: (0, j)),
                pl.BlockSpec((1, tn), lambda j, i: (0, j)),
            ],
            out_specs=pl.BlockSpec((tb, tn), lambda j, i: (i, j)),
        ),
        compiler_params=pltpu.CompilerParams(
            dimension_semantics=("parallel", "parallel"),
            vmem_limit_bytes=32 * 1024 * 1024),
        cost_estimate=fc4_cost,
    )(h3, w4b, b4p)

    # Because the fc4 columns were pre-permuted to point-major order, this
    # reshape IS the module's view(B, 6, N).transpose(1, 2).contiguous() —
    # pure metadata, no extra HBM pass.
    return out_flat.reshape(B, num_points, 6)


# --------------------------------------------------------------------------
# Parameter handling
# --------------------------------------------------------------------------
def init_torch_style_params(key, bottleneck=BOTTLENECK, num_points=NUM_POINTS):
    """Synthetic parameters in PyTorch layout: Linear weight (out, in)."""
    dims = [(bottleneck, bottleneck), (bottleneck, bottleneck // 2),
            (bottleneck // 2, bottleneck // 4), (bottleneck // 4, num_points * 6)]
    p = {}
    for idx, (fan_in, fan_out) in enumerate(dims, start=1):
        kw, kb, key = jax.random.split(key, 3)
        bound = 1.0 / (fan_in ** 0.5)
        p[f"w{idx}"] = jax.random.uniform(kw, (fan_out, fan_in), jnp.float32,
                                          -bound, bound)
        p[f"b{idx}"] = jax.random.uniform(kb, (fan_out,), jnp.float32,
                                          -bound, bound)
    # Non-trivial BN affine params so that path is actually exercised.
    for idx, width in enumerate((bottleneck, bottleneck // 2, bottleneck // 4),
                                start=1):
        kg, kb2, key = jax.random.split(key, 3)
        p[f"g{idx}"] = 1.0 + 0.1 * jax.random.normal(kg, (width,), jnp.float32)
        p[f"be{idx}"] = 0.1 * jax.random.normal(kb2, (width,), jnp.float32)
    return p


def prepare_params(p, num_points=NUM_POINTS):
    """One-time conversion from PyTorch layout to kernel-ready packed format."""
    d1, d2, d3 = p["w1"].shape[0], p["w2"].shape[0], p["w3"].shape[0]
    n_out = p["w4"].shape[0]
    assert n_out == num_points * 6

    # Linear weights: (out, in) -> (in, out), bf16 for the MXU.
    w1b = p["w1"].T.astype(jnp.bfloat16)
    w2b = p["w2"].T.astype(jnp.bfloat16)
    w3b = p["w3"].T.astype(jnp.bfloat16)

    # fc4: permute columns from channel-major (c*N + p) to point-major
    # (p*6 + c) so the kernel's flat output is already (B, N, 6) row-major.
    w4 = p["w4"].T  # (d3, 6*N)
    w4b = (w4.reshape(d3, 6, num_points).transpose(0, 2, 1)
              .reshape(d3, n_out).astype(jnp.bfloat16))
    b4p = (p["b4"].reshape(6, num_points).T.reshape(1, n_out)
              .astype(jnp.float32))

    # BN affine params packed into one (6, d1) array, rows [g1,be1,...,g3,be3],
    # zero-padded to width d1.  fc biases b1..b3 are dropped: training-mode BN
    # subtracts the batch mean so they cancel exactly.
    def pad_row(v):
        return jnp.pad(v, (0, d1 - v.shape[0]))

    bn_packed = jnp.stack([pad_row(p["g1"]), pad_row(p["be1"]),
                           pad_row(p["g2"]), pad_row(p["be2"]),
                           pad_row(p["g3"]), pad_row(p["be3"])], axis=0)

    return dict(w1b=w1b, w2b=w2b, w3b=w3b, bn_packed=bn_packed,
                w4b=w4b, b4p=b4p)


# --------------------------------------------------------------------------
# Pure-JAX reference (op-for-op PyTorch semantics, training-mode BN)
# --------------------------------------------------------------------------
def reference_forward(x, p, num_points=NUM_POINTS):
    def linear(h, w, b):
        return jnp.dot(h.astype(jnp.bfloat16), w.T.astype(jnp.bfloat16),
                       preferred_element_type=jnp.float32) + b

    def bn(h, gamma, beta):
        mean = jnp.mean(h, axis=0, keepdims=True)
        var = jnp.mean((h - mean) ** 2, axis=0, keepdims=True)
        return (h - mean) / jnp.sqrt(var + BN_EPS) * gamma + beta

    h = jax.nn.relu(bn(linear(x, p["w1"], p["b1"]), p["g1"], p["be1"]))
    h = jax.nn.relu(bn(linear(h, p["w2"], p["b2"]), p["g2"], p["be2"]))
    h = jax.nn.relu(bn(linear(h, p["w3"], p["b3"]), p["g3"], p["be3"]))
    o = jnp.tanh(linear(h, p["w4"], p["b4"]))
    B = x.shape[0]
    return jnp.transpose(o.reshape(B, 6, num_points), (0, 2, 1))


if __name__ == "__main__":
    key = jax.random.PRNGKey(0)
    kx, kp = jax.random.split(key)
    x = jax.random.normal(kx, (BATCH, BOTTLENECK), jnp.float32)

    torch_params = init_torch_style_params(kp)
    prep = prepare_params(torch_params, NUM_POINTS)

    out = jax.block_until_ready(point_decoder_normal(x, prep, NUM_POINTS))

    assert out.shape == (BATCH, NUM_POINTS, 6), out.shape
    assert out.dtype == jnp.float32
    assert bool(jnp.all(jnp.isfinite(out)))
    assert bool(jnp.all(jnp.abs(out) <= 1.0 + 1e-6))  # tanh range

    ref = jax.block_until_ready(reference_forward(x, torch_params, NUM_POINTS))
    max_err = float(jnp.max(jnp.abs(out - ref)))
    assert max_err < 2e-2, f"max abs err vs reference: {max_err}"

    print("KERNEL_OK")
</pallas_src>

<mosaic_0001>
module attributes {stable_mosaic.version = 11 : i64} {
  func.func @_mlp_bn_kernel(%arg0: i32, %arg1: memref<8x32xf32, #tpu.memory_space<vmem>>, %arg2: memref<32x32xbf16, #tpu.memory_space<vmem>>, %arg3: memref<32x16xbf16, #tpu.memory_space<vmem>>, %arg4: memref<16x8xbf16, #tpu.memory_space<vmem>>, %arg5: memref<6x32xf32, #tpu.memory_space<vmem>>, %arg6: memref<8x8xf32, #tpu.memory_space<vmem>>) attributes {dimension_semantics = [#tpu.dimension_semantics<arbitrary>], iteration_bounds = array<i64: 1>, scalar_prefetch = 0 : i64, scratch_operands = 0 : i64, tpu.core_type = #tpu.core_type<tc>, window_params = [{pipeline_mode = #tpu.pipeline_mode<synchronous>, transform_indices = @transform_0, window_bounds = array<i64: 8, 32>}, {pipeline_mode = #tpu.pipeline_mode<synchronous>, transform_indices = @transform_1, window_bounds = array<i64: 32, 32>}, {pipeline_mode = #tpu.pipeline_mode<synchronous>, transform_indices = @transform_2, window_bounds = array<i64: 32, 16>}, {pipeline_mode = #tpu.pipeline_mode<synchronous>, transform_indices = @transform_3, window_bounds = array<i64: 16, 8>}, {pipeline_mode = #tpu.pipeline_mode<synchronous>, transform_indices = @transform_4, window_bounds = array<i64: 6, 32>}, {pipeline_mode = #tpu.pipeline_mode<synchronous>, transform_indices = @transform_5, window_bounds = array<i64: 8, 8>}]} {
    %c0 = arith.constant 0 : index
    %c0_0 = arith.constant 0 : index
    %0 = vector.load %arg1[%c0, %c0_0] : memref<8x32xf32, #tpu.memory_space<vmem>>, vector<8x32xf32>
    %1 = arith.truncf %0 : vector<8x32xf32> to vector<8x32xbf16>
    %c0_1 = arith.constant 0 : index
    %c0_2 = arith.constant 0 : index
    %2 = vector.load %arg2[%c0_1, %c0_2] : memref<32x32xbf16, #tpu.memory_space<vmem>>, vector<32x32xbf16>
    %cst = arith.constant dense<0.000000e+00> : vector<8x32xf32>
    %3 = tpu.matmul %1, %2, %cst {dimension_numbers = #tpu.dot_dimension_numbers<[1], [0], [0], [1], [0, 0, 1, 1], [], []>} : vector<8x32xbf16>, vector<32x32xbf16>, vector<8x32xf32> -> vector<8x32xf32>
    %c0_3 = arith.constant 0 : index
    %c0_4 = arith.constant 0 : index
    %4 = vector.load %arg5[%c0_3, %c0_4] : memref<6x32xf32, #tpu.memory_space<vmem>>, vector<1x32xf32>
    %c1 = arith.constant 1 : index
    %c0_5 = arith.constant 0 : index
    %5 = vector.load %arg5[%c1, %c0_5] : memref<6x32xf32, #tpu.memory_space<vmem>>, vector<1x32xf32>
    %cst_6 = arith.constant dense<0.000000e+00> : vector<32xf32>
    %6 = vector.multi_reduction <add>, %3, %cst_6 [0] : vector<8x32xf32> to vector<32xf32>
    %7 = vector.shape_cast %6 : vector<32xf32> to vector<1x32xf32>
    %cst_7 = arith.constant 8.000000e+00 : f32
    %8 = vector.broadcast %cst_7 : f32 to vector<1x32xf32>
    %9 = arith.divf %7, %8 : vector<1x32xf32>
    %10 = arith.mulf %3, %3 : vector<8x32xf32>
    %cst_8 = arith.constant dense<0.000000e+00> : vector<32xf32>
    %11 = vector.multi_reduction <add>, %10, %cst_8 [0] : vector<8x32xf32> to vector<32xf32>
    %12 = vector.shape_cast %11 : vector<32xf32> to vector<1x32xf32>
    %cst_9 = arith.constant 8.000000e+00 : f32
    %13 = vector.broadcast %cst_9 : f32 to vector<1x32xf32>
    %14 = arith.divf %12, %13 : vector<1x32xf32>
    %15 = arith.mulf %9, %9 : vector<1x32xf32>
    %16 = arith.subf %14, %15 : vector<1x32xf32>
    %cst_10 = arith.constant 0.000000e+00 : f32
    %17 = vector.broadcast %cst_10 : f32 to vector<1x32xf32>
    %18 = arith.maximumf %16, %17 : vector<1x32xf32>
    %cst_11 = arith.constant 9.99999974E-6 : f32
    %19 = vector.broadcast %cst_11 : f32 to vector<1x32xf32>
    %20 = arith.addf %18, %19 : vector<1x32xf32>
    %21 = math.rsqrt %20 : vector<1x32xf32>
    %22 = arith.mulf %4, %21 : vector<1x32xf32>
    %23 = arith.mulf %9, %22 : vector<1x32xf32>
    %24 = arith.subf %5, %23 : vector<1x32xf32>
    %25 = vector.broadcast %22 : vector<1x32xf32> to vector<8x32xf32>
    %26 = arith.mulf %3, %25 : vector<8x32xf32>
    %27 = vector.broadcast %24 : vector<1x32xf32> to vector<8x32xf32>
    %28 = arith.addf %26, %27 : vector<8x32xf32>
    %cst_12 = arith.constant 0.000000e+00 : f32
    %29 = vector.broadcast %cst_12 : f32 to vector<8x32xf32>
    %30 = arith.maximumf %28, %29 : vector<8x32xf32>
    %31 = arith.truncf %30 : vector<8x32xf32> to vector<8x32xbf16>
    %c0_13 = arith.constant 0 : index
    %c0_14 = arith.constant 0 : index
    %32 = vector.load %arg3[%c0_13, %c0_14] : memref<32x16xbf16, #tpu.memory_space<vmem>>, vector<32x16xbf16>
    %cst_15 = arith.constant dense<0.000000e+00> : vector<8x16xf32>
    %33 = tpu.matmul %31, %32, %cst_15 {dimension_numbers = #tpu.dot_dimension_numbers<[1], [0], [0], [1], [0, 0, 1, 1], [], []>} : vector<8x32xbf16>, vector<32x16xbf16>, vector<8x16xf32> -> vector<8x16xf32>
    %c2 = arith.constant 2 : index
    %c0_16 = arith.constant 0 : index
    %34 = vector.load %arg5[%c2, %c0_16] : memref<6x32xf32, #tpu.memory_space<vmem>>, vector<1x16xf32>
    %c3 = arith.constant 3 : index
    %c0_17 = arith.constant 0 : index
    %35 = vector.load %arg5[%c3, %c0_17] : memref<6x32xf32, #tpu.memory_space<vmem>>, vector<1x16xf32>
    %cst_18 = arith.constant dense<0.000000e+00> : vector<16xf32>
    %36 = vector.multi_reduction <add>, %33, %cst_18 [0] : vector<8x16xf32> to vector<16xf32>
    %37 = vector.shape_cast %36 : vector<16xf32> to vector<1x16xf32>
    %cst_19 = arith.constant 8.000000e+00 : f32
    %38 = vector.broadcast %cst_19 : f32 to vector<1x16xf32>
    %39 = arith.divf %37, %38 : vector<1x16xf32>
    %40 = arith.mulf %33, %33 : vector<8x16xf32>
    %cst_20 = arith.constant dense<0.000000e+00> : vector<16xf32>
    %41 = vector.multi_reduction <add>, %40, %cst_20 [0] : vector<8x16xf32> to vector<16xf32>
    %42 = vector.shape_cast %41 : vector<16xf32> to vector<1x16xf32>
    %cst_21 = arith.constant 8.000000e+00 : f32
    %43 = vector.broadcast %cst_21 : f32 to vector<1x16xf32>
    %44 = arith.divf %42, %43 : vector<1x16xf32>
    %45 = arith.mulf %39, %39 : vector<1x16xf32>
    %46 = arith.subf %44, %45 : vector<1x16xf32>
    %cst_22 = arith.constant 0.000000e+00 : f32
    %47 = vector.broadcast %cst_22 : f32 to vector<1x16xf32>
    %48 = arith.maximumf %46, %47 : vector<1x16xf32>
    %cst_23 = arith.constant 9.99999974E-6 : f32
    %49 = vector.broadcast %cst_23 : f32 to vector<1x16xf32>
    %50 = arith.addf %48, %49 : vector<1x16xf32>
    %51 = math.rsqrt %50 : vector<1x16xf32>
    %52 = arith.mulf %34, %51 : vector<1x16xf32>
    %53 = arith.mulf %39, %52 : vector<1x16xf32>
    %54 = arith.subf %35, %53 : vector<1x16xf32>
    %55 = vector.broadcast %52 : vector<1x16xf32> to vector<8x16xf32>
    %56 = arith.mulf %33, %55 : vector<8x16xf32>
    %57 = vector.broadcast %54 : vector<1x16xf32> to vector<8x16xf32>
    %58 = arith.addf %56, %57 : vector<8x16xf32>
    %cst_24 = arith.constant 0.000000e+00 : f32
    %59 = vector.broadcast %cst_24 : f32 to vector<8x16xf32>
    %60 = arith.maximumf %58, %59 : vector<8x16xf32>
    %61 = arith.truncf %60 : vector<8x16xf32> to vector<8x16xbf16>
    %c0_25 = arith.constant 0 : index
    %c0_26 = arith.constant 0 : index
    %62 = vector.load %arg4[%c0_25, %c0_26] : memref<16x8xbf16, #tpu.memory_space<vmem>>, vector<16x8xbf16>
    %cst_27 = arith.constant dense<0.000000e+00> : vector<8x8xf32>
    %63 = tpu.matmul %61, %62, %cst_27 {dimension_numbers = #tpu.dot_dimension_numbers<[1], [0], [0], [1], [0, 0, 1, 1], [], []>} : vector<8x16xbf16>, vector<16x8xbf16>, vector<8x8xf32> -> vector<8x8xf32>
    %c4 = arith.constant 4 : index
    %c0_28 = arith.constant 0 : index
    %64 = vector.load %arg5[%c4, %c0_28] : memref<6x32xf32, #tpu.memory_space<vmem>>, vector<1x8xf32>
    %c5 = arith.constant 5 : index
    %c0_29 = arith.constant 0 : index
    %65 = vector.load %arg5[%c5, %c0_29] : memref<6x32xf32, #tpu.memory_space<vmem>>, vector<1x8xf32>
    %cst_30 = arith.constant dense<0.000000e+00> : vector<8xf32>
    %66 = vector.multi_reduction <add>, %63, %cst_30 [0] : vector<8x8xf32> to vector<8xf32>
    %67 = vector.shape_cast %66 : vector<8xf32> to vector<1x8xf32>
    %cst_31 = arith.constant 8.000000e+00 : f32
    %68 = vector.broadcast %cst_31 : f32 to vector<1x8xf32>
    %69 = arith.divf %67, %68 : vector<1x8xf32>
    %70 = arith.mulf %63, %63 : vector<8x8xf32>
    %cst_32 = arith.constant dense<0.000000e+00> : vector<8xf32>
    %71 = vector.multi_reduction <add>, %70, %cst_32 [0] : vector<8x8xf32> to vector<8xf32>
    %72 = vector.shape_cast %71 : vector<8xf32> to vector<1x8xf32>
    %cst_33 = arith.constant 8.000000e+00 : f32
    %73 = vector.broadcast %cst_33 : f32 to vector<1x8xf32>
    %74 = arith.divf %72, %73 : vector<1x8xf32>
    %75 = arith.mulf %69, %69 : vector<1x8xf32>
    %76 = arith.subf %74, %75 : vector<1x8xf32>
    %cst_34 = arith.constant 0.000000e+00 : f32
    %77 = vector.broadcast %cst_34 : f32 to vector<1x8xf32>
    %78 = arith.maximumf %76, %77 : vector<1x8xf32>
    %cst_35 = arith.constant 9.99999974E-6 : f32
    %79 = vector.broadcast %cst_35 : f32 to vector<1x8xf32>
    %80 = arith.addf %78, %79 : vector<1x8xf32>
    %81 = math.rsqrt %80 : vector<1x8xf32>
    %82 = arith.mulf %64, %81 : vector<1x8xf32>
    %83 = arith.mulf %69, %82 : vector<1x8xf32>
    %84 = arith.subf %65, %83 : vector<1x8xf32>
    %85 = vector.broadcast %82 : vector<1x8xf32> to vector<8x8xf32>
    %86 = arith.mulf %63, %85 : vector<8x8xf32>
    %87 = vector.broadcast %84 : vector<1x8xf32> to vector<8x8xf32>
    %88 = arith.addf %86, %87 : vector<8x8xf32>
    %cst_36 = arith.constant 0.000000e+00 : f32
    %89 = vector.broadcast %cst_36 : f32 to vector<8x8xf32>
    %90 = arith.maximumf %88, %89 : vector<8x8xf32>
    %c0_37 = arith.constant 0 : index
    %c0_38 = arith.constant 0 : index
    %91 = vector.load %arg6[%c0_37, %c0_38] : memref<8x8xf32, #tpu.memory_space<vmem>>, vector<8x8xf32>
    tpu.vector_store %arg6[%c0_37, %c0_38], %90 {strides = array<i32>} : memref<8x8xf32, #tpu.memory_space<vmem>>, vector<8x8xf32>,
    return
  }
  func.func @transform_0(%arg0: i32) -> (i32, i32) {
    %c0_i32 = arith.constant 0 : i32
    %c0_i32_0 = arith.constant 0 : i32
    %c0_i32_1 = arith.constant 0 : i32
    return %c0_i32, %c0_i32_0 : i32, i32
  }
  func.func @transform_1(%arg0: i32) -> (i32, i32) {
    %c0_i32 = arith.constant 0 : i32
    %c0_i32_0 = arith.constant 0 : i32
    %c0_i32_1 = arith.constant 0 : i32
    return %c0_i32, %c0_i32_0 : i32, i32
  }
  func.func @transform_2(%arg0: i32) -> (i32, i32) {
    %c0_i32 = arith.constant 0 : i32
    %c0_i32_0 = arith.constant 0 : i32
    %c0_i32_1 = arith.constant 0 : i32
    return %c0_i32, %c0_i32_0 : i32, i32
  }
  func.func @transform_3(%arg0: i32) -> (i32, i32) {
    %c0_i32 = arith.constant 0 : i32
    %c0_i32_0 = arith.constant 0 : i32
    %c0_i32_1 = arith.constant 0 : i32
    return %c0_i32, %c0_i32_0 : i32, i32
  }
  func.func @transform_4(%arg0: i32) -> (i32, i32) {
    %c0_i32 = arith.constant 0 : i32
    %c0_i32_0 = arith.constant 0 : i32
    %c0_i32_1 = arith.constant 0 : i32
    return %c0_i32, %c0_i32_0 : i32, i32
  }
  func.func @transform_5(%arg0: i32) -> (i32, i32) {
    %c0_i32 = arith.constant 0 : i32
    %c0_i32_0 = arith.constant 0 : i32
    %c0_i32_1 = arith.constant 0 : i32
    return %c0_i32, %c0_i32_0 : i32, i32
  }
}

</mosaic_0001>

<bundles_post_ra>
// kernel: tpu_custom_call.1
= control target key start
LH: loop header
LB: loop body
LE: loop exit
PB: predicated region body
PF: predicated region fallthrough
CT: control target
= control target key end

     0   :  { %v404_v1 = vmov 0.0   ;;  %vm405_vm0 = vmmov 0   ;;  %s503_s0 = inlined_call_operand.vmem [shape: f32[8,32], index: 0, kind: input, shape index: {}]   ;;  %s504_s1 = inlined_call_operand.vmem [shape: bf16[32,32], index: 1, kind: input, shape index: {}]   ;;  %s505_s2 = inlined_call_operand.vmem [shape: bf16[32,16], index: 2, kind: input, shape index: {}]   ;;  %s506_s3 = inlined_call_operand.vmem [shape: bf16[16,8], index: 3, kind: input, shape index: {}]   ;;  %s507_s4 = inlined_call_operand.vmem [shape: f32[6,32], index: 4, kind: input, shape index: {}]   ;;  %s508_s5 = inlined_call_operand.hbm [shape: f32[8,8], index: 5, kind: output, shape index: {}]  }
   0x1   :  { %v369_v0 = vld [vmem:[%s504_s1] sm:$0xff]   ;;  %344 = vmatprep.subr.bf16.mxu0 %v404_v1  ;;  %v370_v2 = vld [vmem:[%s504_s1 + $0x8] sm:$0xff]   ;;  %352 = vmatprep.subr.bf16.mxu1 %v404_v1 }
   0x2   :  { %345 = vmatpush3.bf16.msra.mxu0 %v369_v0  ;;  %348 = vmatprep.mubr.msk.bf16.mxu0 %vm405_vm0, %v404_v1  ;;  %v22_v3 = vld [vmem:[%s503_s0] sm:$0xff] }
   0x3   :  { %346 = vmatprep.subr.bf16.mxu0 %v404_v1  ;;  %356 = vmatprep.mubr.msk.bf16.mxu1 %vm405_vm0, %v404_v1 }
   0x4   :  { %10 = vsyncpa [#allocation3], 0  ;;  %v23_v4 = vpack.c.bf16 %v22_v3, %v22_v3  ;;  %vm40_vm1 = vcmask 261120   ;;  %v371_v5 = vld [vmem:[%s505_s2] sm:$0xff]   ;;  %v372_v6 = vld [vmem:[%s505_s2 + $0x8] sm:$0xff]   ;;  %v112_v32 = vlaneseq  ;;  %vm185_vm2 = vcmask 130048  }
   0x5   :  { %353 = vmatpush3.bf16.msra.mxu1 %v371_v5  ;;  %v84_v34 = vld [vmem:[%s507_s4] sm:$0x1]  ;;  %v85_v38 = vld [vmem:[%s507_s4 + $0x1] sm:$0x1]  ;;  %vm276_vm3 = vcmask 64512   ;;  %s406_s13 = smov [#allocation2]  }
   0x6   :  { %347 = vmatpush3.bf16.msra.mxu0 %v370_v2  ;;  %354 = vmatprep.subr.bf16.mxu1 %v404_v1  ;;  %v113_v33 = vshrl.u32 %v112_v32, 7  ;;  %v373_v47 = vld [vmem:[%s506_s3] sm:$0xff]   ;;  %s320_s14 = sshll.u32 %s406_s13, 4  ;;  %s321_s14 = int_to_ptr.vmem [resolvable:$true] %s320_s14 }
   0x7   :  { %360 = vmatprep.subr.bf16.mxu0 %v404_v1  ;;  %s380_s15 = scalar_lea.vmem %s321_s14, 128  ;;  %p385_p1 = scmp.lt.s32.totalorder %s321_s14, %s321_s14 }
   0x8   :  { %v458_v35 = vsub.s32 0, %v113_v33  ;;  %p381_p0 = scmp.ne.s32.totalorder %s321_s14, %s380_s15  ;;  %p386_p2 = scmp.lt.s32.totalorder %s380_s15, %s380_s15 }
   0x9   :  { %349 = vmatmul.mubr.msk.bf16.vlgmr.msra.gmra.mrb[0].mxu0 %vm40_vm1, %v23_v4  ;;  %355 = vmatpush3.bf16.msra.mxu1 %v372_v6 }
   0xa   :  { %362 = vmatprep.mubr.msk.bf16.mxu0 %vm405_vm0, %v404_v1  ;;  %361 = vmatpush3.bf16.msra.mxu0 %v373_v47  ;;  %v274_v47 = vld [vmem:[%s507_s4 + $0x4] sm:$0x1]  ;;  %p387_p3 = por %p386_p2, %p385_p1 }
   0xc   :  { %p388_p4 = pnand %p387_p3, %p381_p0 }
  0xdc   :  { %v78_v7 = vpop.f32.mrb[0].mxu0 }
  0xdd   :  { %v86_v8 = vsel %vm40_vm1, %v78_v7, 0.0  ;;  %v95_v9 = vmul.f32 %v78_v7, %v78_v7  ;;  %v350_v10 = vpop.f32.mrb[1].mxu0 }
  0xde   :  { %v87_v11 = vrot.slane %v86_v8, 4  ;;  %v81_v12 = vpop.f32.mrb[2].mxu0 }
  0xdf   :  { %v96_v13 = vsel %vm40_vm1, %v95_v9, 0.0  ;;  %v351_v14 = vpop.f32.mrb[3].mxu0  ;;  %v183_v9 = vld [vmem:[%s507_s4 + $0x2] sm:$0x1]  ;;  %v184_v12 = vld [vmem:[%s507_s4 + $0x3] sm:$0x1] }
  0xe0   :  { %v88_v15 = vadd.f32 %v87_v11, %v86_v8  ;;  %v97_v16 = vrot.slane %v96_v13, 4 }
  0xe2   :  { %v89_v17 = vrot.slane %v88_v15, 2  ;;  %v98_v18 = vadd.f32 %v97_v16, %v96_v13 }
  0xe4   :  { %v90_v19 = vadd.f32 %v89_v17, %v88_v15  ;;  %v99_v20 = vrot.slane %v98_v18, 2 }
  0xe6   :  { %v91_v21 = vrot.slane %v90_v19, 1  ;;  %v100_v22 = vadd.f32 %v99_v20, %v98_v18 }
  0xe8   :  { %v92_v23 = vadd.f32 %v91_v21, %v90_v19  ;;  %v101_v24 = vrot.slane %v100_v22, 1 }
  0xea   :  { %v94_v25 = vmul.f32 0.125, %v92_v23  ;;  %v102_v26 = vadd.f32 %v101_v24, %v100_v22 }
  0xec   :  { %v103_v27 = vmul.f32 0.125, %v102_v26  ;;  %v104_v28 = vmul.f32 %v94_v25, %v94_v25 }
  0xee   :  { %v105_v29 = vsub.f32 %v103_v27, %v104_v28 }
  0xf0   :  { %v106_v30 = vmax.f32 %v105_v29, 0.0 }
  0xf2   :  { %v107_v31 = vadd.f32 1e-05, %v106_v30 }
  0xf4   :  { %374 = vrsqrt.f32 %v107_v31 }
  0xfe   :  { %v375_v36 = vpop.eup %374 }
  0xff   :  { %v109_v37 = vmul.f32 %v375_v36, %v84_v34 }
 0x101   :  { %v110_v39 = vmul.f32 %v109_v37, %v94_v25  ;;  %v115_v40 = vrot.slane %v109_v37, %v458_v35 }
 0x103   :  { %v111_v41 = vsub.f32 %v85_v38, %v110_v39  ;;  %v116_v42 = vmul.f32 %v115_v40, %v78_v7 }
 0x105   :  { %v120_v43 = vrot.slane %v111_v41, %v458_v35 }
 0x107   :  { %v121_v44 = vadd.f32 %v120_v43, %v116_v42 }
 0x109   :  { %v122_v45 = vmax.f32 %v121_v44, 0.0 }
 0x10b   :  { %v123_v46 = vpack.c.bf16 %v122_v45, %v122_v45 }
 0x10d   :  { %357 = vmatmul.mubr.msk.bf16.vlgmr.msra.gmra.mrb[0].mxu1 %vm40_vm1, %v123_v46 }
 0x1e0   :  { %v177_v48 = vpop.f32.mrb[0].mxu1 }
 0x1e1   :  { %v186_v49 = vsel %vm185_vm2, %v177_v48, 0.0  ;;  %v194_v50 = vmul.f32 %v177_v48, %v177_v48  ;;  %v358_v51 = vpop.f32.mrb[1].mxu1 }
 0x1e2   :  { %v187_v52 = vrot.slane %v186_v49, 4  ;;  %v180_v53 = vpop.f32.mrb[2].mxu1 }
 0x1e3   :  { %v195_v54 = vsel %vm185_vm2, %v194_v50, 0.0  ;;  %v359_v55 = vpop.f32.mrb[3].mxu1  ;;  %v275_v50 = vld [vmem:[%s507_s4 + $0x5] sm:$0x1] }
 0x1e4   :  { %v188_v56 = vadd.f32 %v187_v52, %v186_v49  ;;  %v196_v57 = vrot.slane %v195_v54, 4 }
 0x1e6   :  { %v189_v58 = vrot.slane %v188_v56, 2  ;;  %v197_v59 = vadd.f32 %v196_v57, %v195_v54 }
 0x1e8   :  { %v190_v60 = vadd.f32 %v189_v58, %v188_v56  ;;  %v198_v61 = vrot.slane %v197_v59, 2 }
 0x1ea   :  { %v191_v62 = vrot.slane %v190_v60, 1  ;;  %v199_v63 = vadd.f32 %v198_v61, %v197_v59 }
 0x1ec   :  { %v192_v0 = vadd.f32 %v191_v62, %v190_v60  ;;  %v200_v1 = vrot.slane %v199_v63, 1 }
 0x1ee   :  { %v193_v2 = vmul.f32 0.125, %v192_v0  ;;  %v201_v3 = vadd.f32 %v200_v1, %v199_v63 }
 0x1f0   :  { %v202_v4 = vmul.f32 0.125, %v201_v3  ;;  %v203_v5 = vmul.f32 %v193_v2, %v193_v2 }
 0x1f2   :  { %v204_v6 = vsub.f32 %v202_v4, %v203_v5 }
 0x1f4   :  { %v205_v7 = vmax.f32 %v204_v6, 0.0 }
 0x1f6   :  { %v206_v8 = vadd.f32 1e-05, %v205_v7 }
 0x1f8   :  { %376 = vrsqrt.f32 %v206_v8 }
 0x202   :  { %v377_v10 = vpop.eup %376 }
 0x203   :  { %v208_v11 = vmul.f32 %v377_v10, %v183_v9 }
 0x205   :  { %v209_v13 = vmul.f32 %v208_v11, %v193_v2  ;;  %v214_v14 = vrot.slane %v208_v11, %v458_v35 }
 0x207   :  { %v210_v15 = vsub.f32 %v184_v12, %v209_v13  ;;  %v215_v16 = vmul.f32 %v214_v14, %v177_v48 }
 0x209   :  { %v219_v17 = vrot.slane %v210_v15, %v458_v35 }
 0x20b   :  { %v220_v18 = vadd.f32 %v219_v17, %v215_v16 }
 0x20d   :  { %v221_v19 = vmax.f32 %v220_v18, 0.0 }
 0x20f   :  { %v222_v20 = vpack.c.bf16 %v221_v19, %v221_v19 }
 0x211   :  { %363 = vmatmul.mubr.msk.bf16.vlgmr.msra.gmra.mrb[4].mxu0 %vm185_vm2, %v222_v20 }
 0x2e4   :  { %v268_v21 = vpop.f32.mrb[4].mxu0 }
 0x2e5   :  { %v277_v22 = vsel %vm276_vm3, %v268_v21, 0.0  ;;  %v285_v23 = vmul.f32 %v268_v21, %v268_v21  ;;  %v364_v24 = vpop.f32.mrb[5].mxu0 }
 0x2e6   :  { %v278_v25 = vrot.slane %v277_v22, 4  ;;  %v271_v26 = vpop.f32.mrb[6].mxu0 }
 0x2e7   :  { %v286_v27 = vsel %vm276_vm3, %v285_v23, 0.0  ;;  %v365_v28 = vpop.f32.mrb[7].mxu0 }
 0x2e8   :  { %v279_v29 = vadd.f32 %v278_v25, %v277_v22  ;;  %v287_v30 = vrot.slane %v286_v27, 4 }
 0x2ea   :  { %v280_v31 = vrot.slane %v279_v29, 2  ;;  %v288_v32 = vadd.f32 %v287_v30, %v286_v27 }
 0x2ec   :  { %v281_v33 = vadd.f32 %v280_v31, %v279_v29  ;;  %v289_v34 = vrot.slane %v288_v32, 2 }
 0x2ee   :  { %v282_v36 = vrot.slane %v281_v33, 1  ;;  %v290_v37 = vadd.f32 %v289_v34, %v288_v32 }
 0x2f0   :  { %v283_v38 = vadd.f32 %v282_v36, %v281_v33  ;;  %v291_v39 = vrot.slane %v290_v37, 1 }
 0x2f2   :  { %v284_v40 = vmul.f32 0.125, %v283_v38  ;;  %v292_v41 = vadd.f32 %v291_v39, %v290_v37 }
 0x2f4   :  { %v293_v42 = vmul.f32 0.125, %v292_v41  ;;  %v294_v43 = vmul.f32 %v284_v40, %v284_v40 }
 0x2f6   :  { %v295_v44 = vsub.f32 %v293_v42, %v294_v43 }
 0x2f8   :  { %v296_v45 = vmax.f32 %v295_v44, 0.0 }
 0x2fa   :  { %v297_v46 = vadd.f32 1e-05, %v296_v45 }
 0x2fc   :  { %378 = vrsqrt.f32 %v297_v46 }
 0x306   :  { %v379_v48 = vpop.eup %378 }
 0x307   :  { %v299_v49 = vmul.f32 %v379_v48, %v274_v47 }
 0x309   :  { %v300_v51 = vmul.f32 %v299_v49, %v284_v40  ;;  %v305_v52 = vrot.slane %v299_v49, %v458_v35 }
 0x30b   :  { %v301_v53 = vsub.f32 %v275_v50, %v300_v51  ;;  %v306_v54 = vmul.f32 %v305_v52, %v268_v21 }
 0x30d   :  { %v310_v55 = vrot.slane %v301_v53, %v458_v35 }
 0x30f   :  { %v311_v56 = vadd.f32 %v310_v55, %v306_v54 }
 0x311   :  { %v312_v57 = vmax.f32 %v311_v56, 0.0 }
 0x313   :  { %313 = vst.msk [vmem:[#allocation2] sm:$0xff] %vm276_vm3, %v312_v57 }
 0x314   :  { %391 = shalt.err (!%p388_p4)
}
 0x315   :  { %s392_s17 = scalar_lea.hbm %s508_s5, 128 }
 0x316   :  { %p393_p5 = scmp.ne.s32.totalorder %s508_s5, %s392_s17  ;;  %p396_p6 = scmp.lt.u32.totalorder %s392_s17, %s508_s5 }
 0x318   :  { %p398_p7 = pnand %p396_p6, %p393_p5 }
 0x31a   :  { %401 = shalt.err (!%p398_p7)
}
 0x31b   :  { %323 = dma.vmem_to_hbm [thread:$0]  %s321_s14, 128, %s508_s5, [#allocation3]  }
 0x31c   :  { %402 = dma.done.wait [#allocation3], 128  }
 0x31d   :  { %403 = vsyncadd [#allocation3], 4294967168 }
 0x31e   :  { %327 = vsyncpa [#allocation3], 1 }

</bundles_post_ra>
